<compile_context>
chip_gen: v7x
topology: tpu7x:2x2x1
jax: 0.10.0
libtpu: 0.0.40
codegen_flags: <defaults>
</compile_context>

<pallas_src>
import functools

import jax
import jax.numpy as jnp
from jax.experimental import pallas as pl
from jax.experimental.pallas import tpu as pltpu

LANE = 128
MAX_TILE_ROWS = 8192  # f32: 8192*128*4 = 4 MiB/block; 2 inputs x 2 bufs = 16 MiB VMEM


def _round_up(x, m):
    return ((x + m - 1) // m) * m


def _sse_partial_kernel(xr_ref, x_ref, out_ref, *, valid_rows_last):
    """Per-tile partial sum of squared error, folded to a (1, 128) lane vector."""
    d = xr_ref[...].astype(jnp.float32) - x_ref[...].astype(jnp.float32)
    sq = d * d
    tile_rows = sq.shape[0]

    if valid_rows_last == tile_rows:
        # Every tile is full: pure VPU fold, no masking anywhere.
        out_ref[...] = jnp.sum(sq, axis=0, keepdims=True)
    else:
        step = pl.program_id(0)
        last = pl.num_programs(0) - 1

        @pl.when(step != last)
        def _():
            out_ref[...] = jnp.sum(sq, axis=0, keepdims=True)

        @pl.when(step == last)
        def _():
            # Partial tail block: only the first `valid_rows_last` rows hold
            # real data (partial-block fill is unspecified) -> static slice,
            # so garbage rows are never summed.
            out_ref[...] = jnp.sum(sq[:valid_rows_last], axis=0, keepdims=True)


def _finalize_kernel(beta_ref, part_ref, mean_ref, logvar_ref,
                     loss_ref, recon_ref, kl_ref, *, n_elems):
    """Tiny single-step kernel: fold SSE partials, KL over latents, beta-combine."""
    sse = jnp.sum(part_ref[...])
    recon = sse * jnp.float32(1.0 / float(n_elems))
    mu = mean_ref[...].astype(jnp.float32)
    lv = logvar_ref[...].astype(jnp.float32)
    # Zero-padded latent entries contribute exactly 0: 1 + 0 - 0 - exp(0) = 0.
    kl = -0.5 * jnp.sum(1.0 + lv - mu * mu - jnp.exp(lv))
    beta = beta_ref[0, 0]
    loss_ref[0, 0] = recon + beta * kl
    recon_ref[0, 0] = recon
    kl_ref[0, 0] = kl


def _as_slab(a):
    """Flatten row-major to (rows, 128). Zero-copy when numel % 128 == 0."""
    n = a.size
    rows = pl.cdiv(n, LANE)
    flat = a.reshape(-1)
    if n % LANE:
        # TODO(synk): rare fallback (numel not a multiple of 128) materializes
        # one padded copy; typical VAE image/latent numels never hit this.
        flat = jnp.pad(flat, (0, rows * LANE - n))
    return flat.reshape(rows, LANE), rows


def _pad_latent(a, kl_rows):
    flat = a.reshape(-1)
    pad = kl_rows * LANE - flat.shape[0]
    if pad:
        flat = jnp.pad(flat, (0, pad))
    return flat.reshape(kl_rows, LANE)


def _vae_loss_impl(x_recon, x, mean, log_var, beta=1.0):
    """Returns (loss, recon_loss, kl_loss) as f32 scalars (PyTorch VAE semantics)."""
    assert x_recon.shape == x.shape
    n_elems = x.size
    n_latent = mean.size
    assert log_var.size == n_latent

    # Lane-dense slabs; no padding copy in the common (numel % 128 == 0) case.
    xr2, rows = _as_slab(x_recon)
    x2, _ = _as_slab(x)

    # Tile selection: biggest lane-dense tile that fits comfortably in VMEM,
    # balanced across grid steps, multiple of 16 when tiled (bf16 packing).
    if rows <= MAX_TILE_ROWS:
        tile_rows = rows                       # whole-array block (any row count ok)
    else:
        tile_rows = _round_up(pl.cdiv(rows, pl.cdiv(rows, MAX_TILE_ROWS)), 16)
    grid_n = pl.cdiv(rows, tile_rows)
    valid_rows_last = rows - (grid_n - 1) * tile_rows

    itemsize = jnp.dtype(x.dtype).itemsize
    cost = pl.CostEstimate(
        flops=3 * n_elems,
        transcendentals=0,
        bytes_accessed=2 * n_elems * itemsize + grid_n * LANE * 4,
    )

    # Streaming, HBM-bandwidth-bound partial-SSE kernel. "parallel" axis ->
    # shardable across TensorCores (v7x); each step owns its output block.
    partials = pl.pallas_call(
        functools.partial(_sse_partial_kernel, valid_rows_last=valid_rows_last),
        out_shape=jax.ShapeDtypeStruct((grid_n, LANE), jnp.float32),
        grid=(grid_n,),
        in_specs=[
            pl.BlockSpec((tile_rows, LANE), lambda i: (i, 0)),   # x_recon tile
            pl.BlockSpec((tile_rows, LANE), lambda i: (i, 0)),   # x tile
        ],
        out_specs=pl.BlockSpec((1, LANE), lambda i: (i, 0)),
        compiler_params=pltpu.CompilerParams(
            dimension_semantics=("parallel",),
            vmem_limit_bytes=48 * 1024 * 1024,
        ),
        cost_estimate=cost,
    )(xr2, x2)

    # Tiny latent slabs (negligible size; zero-padding is exact for KL).
    kl_rows = pl.cdiv(n_latent, LANE)
    mean2 = _pad_latent(mean, kl_rows)
    logvar2 = _pad_latent(log_var, kl_rows)
    beta_arr = jnp.full((1, 1), beta, dtype=jnp.float32)

    scalar_out = jax.ShapeDtypeStruct((1, 1), jnp.float32)
    smem_whole = pl.BlockSpec(memory_space=pltpu.SMEM)

    loss, recon, kl = pl.pallas_call(
        functools.partial(_finalize_kernel, n_elems=n_elems),
        out_shape=(scalar_out, scalar_out, scalar_out),
        grid=(1,),
        in_specs=[
            smem_whole,                                          # beta (SMEM scalar)
            pl.BlockSpec((grid_n, LANE), lambda i: (0, 0)),      # SSE partials
            pl.BlockSpec((kl_rows, LANE), lambda i: (0, 0)),     # mean
            pl.BlockSpec((kl_rows, LANE), lambda i: (0, 0)),     # log_var
        ],
        out_specs=(smem_whole, smem_whole, smem_whole),
        compiler_params=pltpu.CompilerParams(dimension_semantics=("arbitrary",)),
    )(beta_arr, partials, mean2, logvar2)

    return loss[0, 0], recon[0, 0], kl[0, 0]


vae_loss = jax.jit(_vae_loss_impl)


def vae_loss_ref(x_recon, x, mean, log_var, beta=1.0):
    recon = jnp.mean((x_recon - x) ** 2)
    kl = -0.5 * jnp.sum(1.0 + log_var - mean**2 - jnp.exp(log_var))
    return recon + beta * kl, recon, kl


if __name__ == "__main__":
    key = jax.random.PRNGKey(0)
    k1, k2, k3, k4 = jax.random.split(key, 4)

    # --- Small shapes consistent with a VAE forward: images NCHW, latent (B, Z).
    x = jax.random.normal(k1, (2, 4, 16, 16), dtype=jnp.float32)
    x_recon = x + 0.1 * jax.random.normal(k2, (2, 4, 16, 16), dtype=jnp.float32)
    mean = 0.5 * jax.random.normal(k3, (2, 32), dtype=jnp.float32)
    log_var = 0.1 * jax.random.normal(k4, (2, 32), dtype=jnp.float32)

    loss, recon, kl = vae_loss(x_recon, x, mean, log_var, 1.0)
    jax.block_until_ready((loss, recon, kl))
    loss_r, recon_r, kl_r = vae_loss_ref(x_recon, x, mean, log_var, 1.0)
    assert jnp.allclose(loss, loss_r, rtol=1e-5, atol=1e-5), (loss, loss_r)
    assert jnp.allclose(recon, recon_r, rtol=1e-5, atol=1e-5), (recon, recon_r)
    assert jnp.allclose(kl, kl_r, rtol=1e-5, atol=1e-5), (kl, kl_r)

    # --- Medium case: single full-size tile, zero-copy slab path.
    k5, k6, k7, k8 = jax.random.split(jax.random.PRNGKey(1), 4)
    xb = jax.random.normal(k5, (5, 8, 64, 64), dtype=jnp.float32)
    xb_recon = xb + 0.05 * jax.random.normal(k6, (5, 8, 64, 64), dtype=jnp.float32)
    mean_b = 0.3 * jax.random.normal(k7, (5, 64), dtype=jnp.float32)
    logvar_b = 0.2 * jax.random.normal(k8, (5, 64), dtype=jnp.float32)

    loss2, recon2, kl2 = vae_loss(xb_recon, xb, mean_b, logvar_b, 0.5)
    jax.block_until_ready((loss2, recon2, kl2))
    loss2_r, recon2_r, kl2_r = vae_loss_ref(xb_recon, xb, mean_b, logvar_b, 0.5)
    assert jnp.allclose(loss2, loss2_r, rtol=1e-4, atol=1e-4), (loss2, loss2_r)
    assert jnp.allclose(recon2, recon2_r, rtol=1e-4, atol=1e-4), (recon2, recon2_r)
    assert jnp.allclose(kl2, kl2_r, rtol=1e-4, atol=1e-4), (kl2, kl2_r)

    # --- Larger case that exercises the multi-tile "parallel" grid with a
    # partial (statically masked) tail tile: 4*8*200*200 = 1.28M elems -> 10000
    # rows -> 2 balanced tiles of 5008 rows, last tile has 4992 valid rows.
    k9, k10, k11, k12 = jax.random.split(jax.random.PRNGKey(2), 4)
    xc = jax.random.normal(k9, (4, 8, 200, 200), dtype=jnp.float32)
    xc_recon = xc + 0.05 * jax.random.normal(k10, (4, 8, 200, 200), dtype=jnp.float32)
    mean_c = 0.3 * jax.random.normal(k11, (4, 64), dtype=jnp.float32)
    logvar_c = 0.2 * jax.random.normal(k12, (4, 64), dtype=jnp.float32)

    loss3, recon3, kl3 = vae_loss(xc_recon, xc, mean_c, logvar_c, 2.0)
    jax.block_until_ready((loss3, recon3, kl3))
    loss3_r, recon3_r, kl3_r = vae_loss_ref(xc_recon, xc, mean_c, logvar_c, 2.0)
    assert jnp.allclose(loss3, loss3_r, rtol=1e-4, atol=1e-4), (loss3, loss3_r)
    assert jnp.allclose(recon3, recon3_r, rtol=1e-4, atol=1e-4), (recon3, recon3_r)
    assert jnp.allclose(kl3, kl3_r, rtol=1e-4, atol=1e-4), (kl3, kl3_r)

    print("KERNEL_OK")
</pallas_src>

<mosaic_0001>
module attributes {stable_mosaic.version = 11 : i64} {
  func.func @_sse_partial_kernel(%arg0: i32, %arg1: memref<16x128xf32, #tpu.memory_space<vmem>>, %arg2: memref<16x128xf32, #tpu.memory_space<vmem>>, %arg3: memref<1x128xf32, #tpu.memory_space<vmem>>) attributes {dimension_semantics = [#tpu.dimension_semantics<parallel>], iteration_bounds = array<i64: 1>, scalar_prefetch = 0 : i64, scratch_operands = 0 : i64, tpu.core_type = #tpu.core_type<tc>, window_params = [{transform_indices = @transform_0, window_bounds = array<i64: 16, 128>}, {transform_indices = @transform_1, window_bounds = array<i64: 16, 128>}, {transform_indices = @transform_2, window_bounds = array<i64: 1, 128>}]} {
    %c0 = arith.constant 0 : index
    %c0_0 = arith.constant 0 : index
    %0 = vector.load %arg1[%c0, %c0_0] : memref<16x128xf32, #tpu.memory_space<vmem>>, vector<16x128xf32>
    %c0_1 = arith.constant 0 : index
    %c0_2 = arith.constant 0 : index
    %1 = vector.load %arg2[%c0_1, %c0_2] : memref<16x128xf32, #tpu.memory_space<vmem>>, vector<16x128xf32>
    %2 = arith.subf %0, %1 : vector<16x128xf32>
    %3 = arith.mulf %2, %2 : vector<16x128xf32>
    %cst = arith.constant dense<0.000000e+00> : vector<128xf32>
    %4 = vector.multi_reduction <add>, %3, %cst [0] : vector<16x128xf32> to vector<128xf32>
    %5 = vector.shape_cast %4 : vector<128xf32> to vector<1x128xf32>
    %c0_3 = arith.constant 0 : index
    %c0_4 = arith.constant 0 : index
    %6 = vector.load %arg3[%c0_3, %c0_4] : memref<1x128xf32, #tpu.memory_space<vmem>>, vector<1x128xf32>
    tpu.vector_store %arg3[%c0_3, %c0_4], %5 {strides = array<i32>} : memref<1x128xf32, #tpu.memory_space<vmem>>, vector<1x128xf32>,
    return
  }
  func.func @transform_0(%arg0: i32) -> (i32, i32) {
    %c0_i32 = arith.constant 0 : i32
    %c0_i32_0 = arith.constant 0 : i32
    return %arg0, %c0_i32 : i32, i32
  }
  func.func @transform_1(%arg0: i32) -> (i32, i32) {
    %c0_i32 = arith.constant 0 : i32
    %c0_i32_0 = arith.constant 0 : i32
    return %arg0, %c0_i32 : i32, i32
  }
  func.func @transform_2(%arg0: i32) -> (i32, i32) {
    %c0_i32 = arith.constant 0 : i32
    %c0_i32_0 = arith.constant 0 : i32
    return %arg0, %c0_i32 : i32, i32
  }
}

module attributes {stable_mosaic.version = 11 : i64} {
  func.func @_finalize_kernel(%arg0: i32, %arg1: memref<1x1xf32, #tpu.memory_space<smem>>, %arg2: memref<1x128xf32, #tpu.memory_space<vmem>>, %arg3: memref<1x128xf32, #tpu.memory_space<vmem>>, %arg4: memref<1x128xf32, #tpu.memory_space<vmem>>, %arg5: memref<1x1xf32, #tpu.memory_space<smem>>, %arg6: memref<1x1xf32, #tpu.memory_space<smem>>, %arg7: memref<1x1xf32, #tpu.memory_space<smem>>) attributes {dimension_semantics = [#tpu.dimension_semantics<arbitrary>], iteration_bounds = array<i64: 1>, scalar_prefetch = 0 : i64, scratch_operands = 0 : i64, tpu.core_type = #tpu.core_type<tc>, window_params = [{transform_indices = @transform_0, window_bounds = array<i64: 1, 1>}, {pipeline_mode = #tpu.pipeline_mode<synchronous>, transform_indices = @transform_1, window_bounds = array<i64: 1, 128>}, {pipeline_mode = #tpu.pipeline_mode<synchronous>, transform_indices = @transform_2, window_bounds = array<i64: 1, 128>}, {pipeline_mode = #tpu.pipeline_mode<synchronous>, transform_indices = @transform_3, window_bounds = array<i64: 1, 128>}, {transform_indices = @transform_4, window_bounds = array<i64: 1, 1>}, {transform_indices = @transform_5, window_bounds = array<i64: 1, 1>}, {transform_indices = @transform_6, window_bounds = array<i64: 1, 1>}]} {
    %c0 = arith.constant 0 : index
    %c0_0 = arith.constant 0 : index
    %0 = vector.load %arg2[%c0, %c0_0] : memref<1x128xf32, #tpu.memory_space<vmem>>, vector<1x128xf32>
    %1 = vector.shape_cast %0 : vector<1x128xf32> to vector<1x1x128xf32>
    %cst = arith.constant dense<0.000000e+00> : vector<1xf32>
    %2 = vector.multi_reduction <add>, %1, %cst [1, 2] : vector<1x1x128xf32> to vector<1xf32>
    %3 = vector.shape_cast %2 : vector<1xf32> to vector<1x1x1xf32>
    %4 = vector.extract %3[0, 0, 0] : f32 from vector<1x1x1xf32>
    %cst_1 = arith.constant 4.8828125E-4 : f32
    %5 = arith.mulf %4, %cst_1 : f32
    %c0_2 = arith.constant 0 : index
    %c0_3 = arith.constant 0 : index
    %6 = vector.load %arg3[%c0_2, %c0_3] : memref<1x128xf32, #tpu.memory_space<vmem>>, vector<1x128xf32>
    %c0_4 = arith.constant 0 : index
    %c0_5 = arith.constant 0 : index
    %7 = vector.load %arg4[%c0_4, %c0_5] : memref<1x128xf32, #tpu.memory_space<vmem>>, vector<1x128xf32>
    %cst_6 = arith.constant 1.000000e+00 : f32
    %8 = vector.broadcast %cst_6 : f32 to vector<1x128xf32>
    %9 = arith.addf %8, %7 : vector<1x128xf32>
    %10 = arith.mulf %6, %6 : vector<1x128xf32>
    %11 = arith.subf %9, %10 : vector<1x128xf32>
    %12 = math.exp %7 : vector<1x128xf32>
    %13 = arith.subf %11, %12 : vector<1x128xf32>
    %14 = vector.shape_cast %13 : vector<1x128xf32> to vector<1x1x128xf32>
    %cst_7 = arith.constant dense<0.000000e+00> : vector<1xf32>
    %15 = vector.multi_reduction <add>, %14, %cst_7 [1, 2] : vector<1x1x128xf32> to vector<1xf32>
    %16 = vector.shape_cast %15 : vector<1xf32> to vector<1x1x1xf32>
    %17 = vector.extract %16[0, 0, 0] : f32 from vector<1x1x1xf32>
    %cst_8 = arith.constant -5.000000e-01 : f32
    %18 = arith.mulf %cst_8, %17 : f32
    %c0_9 = arith.constant 0 : index
    %c0_10 = arith.constant 0 : index
    %19 = memref.load %arg1[%c0_9, %c0_10] : memref<1x1xf32, #tpu.memory_space<smem>>
    %20 = arith.mulf %19, %18 : f32
    %21 = arith.addf %5, %20 : f32
    %c0_11 = arith.constant 0 : index
    %c0_12 = arith.constant 0 : index
    %22 = memref.load %arg5[%c0_11, %c0_12] : memref<1x1xf32, #tpu.memory_space<smem>>
    memref.store %21, %arg5[%c0_11, %c0_12] : memref<1x1xf32, #tpu.memory_space<smem>>
    %c0_13 = arith.constant 0 : index
    %c0_14 = arith.constant 0 : index
    %23 = memref.load %arg6[%c0_13, %c0_14] : memref<1x1xf32, #tpu.memory_space<smem>>
    memref.store %5, %arg6[%c0_13, %c0_14] : memref<1x1xf32, #tpu.memory_space<smem>>
    %c0_15 = arith.constant 0 : index
    %c0_16 = arith.constant 0 : index
    %24 = memref.load %arg7[%c0_15, %c0_16] : memref<1x1xf32, #tpu.memory_space<smem>>
    memref.store %18, %arg7[%c0_15, %c0_16] : memref<1x1xf32, #tpu.memory_space<smem>>
    return
  }
  func.func @transform_0(%arg0: i32) -> (i32, i32) {
    %c0_i32 = arith.constant 0 : i32
    %c0_i32_0 = arith.constant 0 : i32
    %c0_i32_1 = arith.constant 0 : i32
    return %c0_i32, %c0_i32_0 : i32, i32
  }
  func.func @transform_1(%arg0: i32) -> (i32, i32) {
    %c0_i32 = arith.constant 0 : i32
    %c0_i32_0 = arith.constant 0 : i32
    %c0_i32_1 = arith.constant 0 : i32
    return %c0_i32, %c0_i32_0 : i32, i32
  }
  func.func @transform_2(%arg0: i32) -> (i32, i32) {
    %c0_i32 = arith.constant 0 : i32
    %c0_i32_0 = arith.constant 0 : i32
    %c0_i32_1 = arith.constant 0 : i32
    return %c0_i32, %c0_i32_0 : i32, i32
  }
  func.func @transform_3(%arg0: i32) -> (i32, i32) {
    %c0_i32 = arith.constant 0 : i32
    %c0_i32_0 = arith.constant 0 : i32
    %c0_i32_1 = arith.constant 0 : i32
    return %c0_i32, %c0_i32_0 : i32, i32
  }
  func.func @transform_4(%arg0: i32) -> (i32, i32) {
    %c0_i32 = arith.constant 0 : i32
    %c0_i32_0 = arith.constant 0 : i32
    %c0_i32_1 = arith.constant 0 : i32
    return %c0_i32, %c0_i32_0 : i32, i32
  }
  func.func @transform_5(%arg0: i32) -> (i32, i32) {
    %c0_i32 = arith.constant 0 : i32
    %c0_i32_0 = arith.constant 0 : i32
    %c0_i32_1 = arith.constant 0 : i32
    return %c0_i32, %c0_i32_0 : i32, i32
  }
  func.func @transform_6(%arg0: i32) -> (i32, i32) {
    %c0_i32 = arith.constant 0 : i32
    %c0_i32_0 = arith.constant 0 : i32
    %c0_i32_1 = arith.constant 0 : i32
    return %c0_i32, %c0_i32_0 : i32, i32
  }
}

</mosaic_0001>

<bundles_post_ra>
// kernel: _vae_loss_impl.2
= control target key start
LH: loop header
LB: loop body
LE: loop exit
PB: predicated region body
PF: predicated region fallthrough
CT: control target
= control target key end

     0   :  { %s61_s0 = inlined_call_operand.vmem [shape: f32[16,128], index: 0, kind: input, shape index: {}]   ;;  %s62_s1 = inlined_call_operand.vmem [shape: f32[16,128], index: 1, kind: input, shape index: {}]   ;;  %s63_s2 = inlined_call_operand.vmem [shape: f32[1,128], index: 2, kind: output, shape index: {}]  }
   0x1   :  { %v11_v0 = vld [vmem:[%s61_s0] sm:$0xff]  ;;  %v12_v1 = vld [vmem:[%s61_s0 + $0x8] sm:$0xff] }
   0x2   :  { %v13_v2 = vld [vmem:[%s62_s1] sm:$0xff]  ;;  %v14_v3 = vld [vmem:[%s62_s1 + $0x8] sm:$0xff] }
   0x3   :  { %v15_v4 = vsub.f32 %v11_v0, %v13_v2  ;;  %v16_v5 = vsub.f32 %v12_v1, %v14_v3 }
   0x5   :  { %v17_v6 = vmul.f32 %v15_v4, %v15_v4  ;;  %v18_v7 = vmul.f32 %v16_v5, %v16_v5 }
   0x7   :  { %v19_v8 = vadd.f32 %v18_v7, %v17_v6 }
   0x9   :  { %v20_v9 = vrot.slane %v19_v8, 4 }
   0xb   :  { %v21_v10 = vadd.f32 %v20_v9, %v19_v8 }
   0xd   :  { %v22_v11 = vrot.slane %v21_v10, 2 }
   0xf   :  { %v23_v12 = vadd.f32 %v22_v11, %v21_v10 }
  0x11   :  { %v24_v13 = vrot.slane %v23_v12, 1 }
  0x13   :  { %v25_v14 = vadd.f32 %v24_v13, %v23_v12 }
  0x15   :  { %26 = vst [vmem:[%s63_s2] sm:$0x1] %v25_v14 }

// kernel: _vae_loss_impl.3
= control target key start
LH: loop header
LB: loop body
LE: loop exit
PB: predicated region body
PF: predicated region fallthrough
CT: control target
= control target key end

     0   :  { %13 = vsyncpa [#allocation4], 0  ;;  %vm24_vm0 = vcmask 1040384   ;;  %s229_s0 = inlined_call_operand.<no memory space> [shape: f32[1,1], index: 0, kind: input, shape index: {}]   ;;  %s230_s1 = inlined_call_operand.vmem [shape: f32[1,128], index: 1, kind: input, shape index: {}]   ;;  %s231_s2 = inlined_call_operand.vmem [shape: f32[1,128], index: 2, kind: input, shape index: {}]   ;;  %s232_s3 = inlined_call_operand.vmem [shape: f32[1,128], index: 3, kind: input, shape index: {}]   ;;  %s233_s4 = inlined_call_operand.hbm [shape: f32[1,1], index: 4, kind: output, shape index: {0}]   ;;  %s234_s5 = inlined_call_operand.hbm [shape: f32[1,1], index: 5, kind: output, shape index: {1}]   ;;  %s235_s6 = inlined_call_operand.hbm [shape: f32[1,1], index: 6, kind: output, shape index: {2}]  }
   0x1   :  { %v23_v0 = vld [vmem:[%s230_s1] sm:$0x1] }
   0x2   :  { %v25_v1 = vsel %vm24_vm0, %v23_v0, 0.0  ;;  %v37_v2 = vld [vmem:[%s232_s3] sm:$0x1] }
   0x3   :  { %14 = vsyncpa [#allocation6], 0  ;;  %26 = vadd.xlane.f32.xlu0 %v25_v1  ;;  %v41_v3 = vmul.f32 1.442695, %v37_v2  ;;  %v36_v4 = vld [vmem:[%s231_s2] sm:$0x1] }
   0x4   :  { %v38_v5 = vadd.f32 1.0, %v37_v2  ;;  %v39_v6 = vmul.f32 %v36_v4, %v36_v4  ;;  %s109_s28 = scalar_lea.hbm %s234_s5, 16 }
   0x5   :  { %107 = vpow2.f32 %v41_v3  ;;  %p110_p0 = scmp.ne.s32.totalorder %s234_s5, %s109_s28  ;;  %p113_p1 = scmp.lt.u32.totalorder %s109_s28, %s234_s5 }
   0x6   :  { %v40_v7 = vsub.f32 %v38_v5, %v39_v6 }
   0x7   :  { %p115_p2 = pnand %p113_p1, %p110_p0 }
   0xf   :  { %v108_v8 = vpop.eup %107 }
  0x10   :  { %v43_v9 = vsub.f32 %v40_v7, %v108_v8 }
  0x12   :  { %v44_v10 = vsel %vm24_vm0, %v43_v9, 0.0 }
  0x13   :  { %45 = vadd.xlane.f32.xlu0 %v44_v10 }
  0x90   :  { %v27_v11 = vpop.xlane.xlu0 %26 }
  0x91   :  { %v28_v12 = vrot.slane %v27_v11, 4 }
  0x93   :  { %v29_v13 = vadd.f32 %v28_v12, %v27_v11 }
  0x95   :  { %v30_v14 = vrot.slane %v29_v13, 2 }
  0x97   :  { %v31_v15 = vadd.f32 %v30_v14, %v29_v13 }
  0x99   :  { %v32_v16 = vrot.slane %v31_v15, 1 }
  0x9b   :  { %v33_v17 = vadd.f32 %v32_v16, %v31_v15 }
  0x9d   :  { %100 = vpush %v33_v17 }
  0xa0   :  { %v46_v18 = vpop.xlane.xlu0 %45 }
  0xa1   :  { %v47_v19 = vrot.slane %v46_v18, 4 }
  0xa3   :  { %v48_v20 = vadd.f32 %v47_v19, %v46_v18 }
  0xa5   :  { %v49_v21 = vrot.slane %v48_v20, 2 }
  0xa7   :  { %v50_v22 = vadd.f32 %v49_v21, %v48_v20 }
  0xa9   :  { %v51_v23 = vrot.slane %v50_v22, 1 }
  0xab   :  { %v52_v24 = vadd.f32 %v51_v23, %v50_v22 }
  0xad   :  { %102 = vpush %v52_v24 }
  0xce   :  { %s101_s1 = spop %100 }
  0xcf   :  { %s35_s2 = smul.f32 0.00048828125, %s101_s1 }
  0xd1   :  { %61 = sst [smem:[#allocation5]] %s35_s2 }
  0xd2   :  { %118 = shalt.err (!%p115_p2)
}
  0xd3   :  { %s143_s9 = smov [#allocation5]   ;;  %s119_s19 = scalar_lea.hbm %s235_s6, 16 }
  0xd4   :  { %79 = dma.smem_to_hbm %s143_s9, 16, %s234_s5, [#allocation6]  }
  0xd5   :  { %p120_p3 = scmp.ne.s32.totalorder %s235_s6, %s119_s19  ;;  %p123_p4 = scmp.lt.u32.totalorder %s119_s19, %s235_s6 }
  0xd7   :  { %p125_p5 = pnand %p123_p4, %p120_p3 }
  0xde   :  { %s103_s12 = spop %102 }
  0xdf   :  { %s54_s13 = smul.f32 -0.5, %s103_s12 }
  0xe1   :  { %s56_s16 = smul.f32 %s54_s13, %s229_s0  ;;  %63 = sst [smem:[#allocation7]] %s54_s13 }
  0xe2   :  { %128 = shalt.err (!%p125_p5)
}
  0xe3   :  { %s144_s5 = smov [#allocation7]   ;;  %s57_s0 = sadd.f32 %s56_s16, %s35_s2 }
  0xe4   :  { %87 = dma.smem_to_hbm %s144_s5, 16, %s235_s6, [#allocation6]  }
  0xe5   :  { %59 = sst [smem:[#allocation3]] %s57_s0  ;;  %s129_s3 = scalar_lea.hbm %s233_s4, 16 }
  0xe6   :  { %p130_p6 = scmp.ne.s32.totalorder %s233_s4, %s129_s3  ;;  %p133_p7 = scmp.lt.u32.totalorder %s129_s3, %s233_s4 }
  0xe8   :  { %p135_p8 = pnand %p133_p7, %p130_p6 }
  0xea   :  { %138 = shalt.err (!%p135_p8)
}
  0xeb   :  { %s145_s7 = smov [#allocation3]  }
  0xec   :  { %71 = dma.smem_to_hbm %s145_s7, 16, %s233_s4, [#allocation4]  }
  0xed   :  { %139 = dma.done.wait [#allocation4], 16  }
  0xee   :  { %140 = vsyncadd [#allocation4], 4294967280 }
  0xef   :  { %141 = dma.done.wait [#allocation6], 32  }
  0xf0   :  { %142 = vsyncadd [#allocation6], 4294967264 }
  0xf1   :  { %97 = sfence }
  0xf2   :  { %98 = vsyncpa [#allocation4], 1 }
  0xf3   :  { %99 = vsyncpa [#allocation6], 1 }

</bundles_post_ra>
